<compile_context>
chip_gen: v5e
topology: v5e:2x2
jax: 0.10.0
libtpu: 0.0.40
codegen_flags: <defaults>
</compile_context>

<pallas_src>
import jax
import jax.numpy as jnp
from jax.experimental import pallas as pl
from jax.experimental.pallas import tpu as pltpu

LANE = 128      # lane width (last dim)
SUBLANE = 8     # sublane width (second-to-last dim)
MAX_TM = 512    # M-tile cap so big batches stay well inside scoped VMEM


def _round_up(n, m):
    return ((n + m - 1) // m) * m


def _dict_dense_kernel(choice_ref, x_ref, w_ref, o_ref):
    # choice_ref (SMEM) is consumed by the weight index_map; unused in the body.
    # x_ref: (TM, 128)  w_ref: (1, 128, 128) selected slab  o_ref: (TM, 128)
    del choice_ref
    o_ref[...] = jnp.dot(x_ref[...], w_ref[0], preferred_element_type=jnp.float32)


def dict_dense_forward(x, w_stack, choice_idx):
    """x: (M, K<=128) float32; w_stack: (num_choices, 128, 128) zero-padded
    weights; choice_idx: int selecting the weight slab.  Returns the padded
    (M_pad, 128) result; caller slices out the real (M, N) block."""
    M, K = x.shape
    assert K <= LANE, f"K={K} exceeds one lane tile"

    # Tile M: small batches -> one sublane-aligned block; big batches -> 512-row
    # tiles over a parallel grid.
    TM = MAX_TM if M > MAX_TM else max(SUBLANE, _round_up(M, SUBLANE))
    M_pad = _round_up(max(M, TM), TM)

    # Zero-pad x to a lane-dense (M_pad, 128) slab (zeros in padded K rows keep
    # the contraction exact).
    x_pad = jnp.zeros((M_pad, LANE), dtype=jnp.float32)
    x_pad = x_pad.at[:M, :K].set(x.astype(jnp.float32))

    choice_arr = jnp.asarray([choice_idx], dtype=jnp.int32)
    grid = (M_pad // TM,)

    out = pl.pallas_call(
        _dict_dense_kernel,
        out_shape=jax.ShapeDtypeStruct((M_pad, LANE), jnp.float32),
        grid_spec=pltpu.PrefetchScalarGridSpec(
            num_scalar_prefetch=1,
            grid=grid,
            in_specs=[
                pl.BlockSpec((TM, LANE), lambda i, choice: (i, 0)),
                # Runtime weight selection: block index along the stack axis
                # comes from the scalar-prefetch choice.
                pl.BlockSpec((1, LANE, LANE), lambda i, choice: (choice[0], 0, 0)),
            ],
            out_specs=pl.BlockSpec((TM, LANE), lambda i, choice: (i, 0)),
        ),
        compiler_params=pltpu.CompilerParams(
            dimension_semantics=("parallel",),
        ),
    )(choice_arr, x_pad, w_stack)
    return out


class MyDictDense:
    """JAX/Pallas port of the PyTorch MyDictDense module."""

    _choice_names = ("linear1", "linear2", "linear3")

    def __init__(self, key):
        k1, k2, k3 = jax.random.split(key, 3)
        # Deterministic stand-in for torch.randn parameter init.
        self.params = {
            "linear1": jax.random.normal(k1, (4, 4), dtype=jnp.float32),
            "linear2": jax.random.normal(k2, (4, 1), dtype=jnp.float32),
            "linear3": jax.random.normal(k3, (4, 2), dtype=jnp.float32),
        }
        self._choice_idx = {n: i for i, n in enumerate(self._choice_names)}
        self._out_dim = {n: self.params[n].shape[1] for n in self._choice_names}

        # Stack + zero-pad all weights once into a single (3, 128, 128) slab so
        # every choice shares one kernel / one weight layout.
        w_stack = jnp.zeros((len(self._choice_names), LANE, LANE), dtype=jnp.float32)
        for i, name in enumerate(self._choice_names):
            w = self.params[name]
            w_stack = w_stack.at[i, : w.shape[0], : w.shape[1]].set(w)
        self.w_stack = w_stack

    def __call__(self, x, choice="linear1"):
        out_padded = dict_dense_forward(x, self.w_stack, self._choice_idx[choice])
        return out_padded[: x.shape[0], : self._out_dim[choice]]


if __name__ == "__main__":
    key = jax.random.PRNGKey(0)
    net = MyDictDense(key)

    # Matches the reference script: x = torch.ones(1, 4)
    x = jnp.ones((1, 4), dtype=jnp.float32)

    outs = {c: net(x, c) for c in ("linear1", "linear2", "linear3")}
    jax.block_until_ready(tuple(outs.values()))

    # Sanity check against plain-JAX reference (torch.mm equivalent).
    for choice, out in outs.items():
        ref = x @ net.params[choice]
        assert out.shape == ref.shape, (choice, out.shape, ref.shape)
        assert jnp.allclose(out, ref, atol=1e-5, rtol=1e-5), choice

    # Batched case: one kernel call amortizes launch/DMA overhead over M=8 rows.
    xb = jax.random.normal(jax.random.PRNGKey(1), (8, 4), dtype=jnp.float32)
    outb = net(xb, "linear3")
    jax.block_until_ready(outb)
    refb = xb @ net.params["linear3"]
    assert outb.shape == refb.shape
    assert jnp.allclose(outb, refb, atol=1e-4, rtol=1e-4)

    print("KERNEL_OK")
</pallas_src>

<mosaic_0001>
module attributes {stable_mosaic.version = 11 : i64} {
  func.func @_dict_dense_kernel(%arg0: i32, %arg1: memref<1xi32, #tpu.memory_space<smem>>, %arg2: memref<8x128xf32, #tpu.memory_space<vmem>>, %arg3: memref<1x128x128xf32, #tpu.memory_space<vmem>>, %arg4: memref<8x128xf32, #tpu.memory_space<vmem>>) attributes {dimension_semantics = [#tpu.dimension_semantics<parallel>], iteration_bounds = array<i64: 1>, scalar_prefetch = 1 : i64, scratch_operands = 0 : i64, tpu.core_type = #tpu.core_type<tc>, window_params = [{transform_indices = @transform_0, window_bounds = array<i64: 8, 128>}, {transform_indices = @transform_1, window_bounds = array<i64: 1, 128, 128>}, {transform_indices = @transform_2, window_bounds = array<i64: 8, 128>}]} {
    %c0 = arith.constant 0 : index
    %c0_0 = arith.constant 0 : index
    %0 = vector.load %arg2[%c0, %c0_0] : memref<8x128xf32, #tpu.memory_space<vmem>>, vector<8x128xf32>
    %c0_1 = arith.constant 0 : index
    %c0_2 = arith.constant 0 : index
    %c0_3 = arith.constant 0 : index
    %1 = vector.load %arg3[%c0_1, %c0_2, %c0_3] : memref<1x128x128xf32, #tpu.memory_space<vmem>>, vector<1x128x128xf32>
    %2 = vector.shape_cast %1 : vector<1x128x128xf32> to vector<128x128xf32>
    %cst = arith.constant dense<0.000000e+00> : vector<8x128xf32>
    %3 = tpu.matmul %0, %2, %cst {dimension_numbers = #tpu.dot_dimension_numbers<[1], [0], [0], [1], [0, 0, 1, 1], [], []>} : vector<8x128xf32>, vector<128x128xf32>, vector<8x128xf32> -> vector<8x128xf32>
    %c0_4 = arith.constant 0 : index
    %c0_5 = arith.constant 0 : index
    %4 = vector.load %arg4[%c0_4, %c0_5] : memref<8x128xf32, #tpu.memory_space<vmem>>, vector<8x128xf32>
    tpu.vector_store %arg4[%c0_4, %c0_5], %3 {strides = array<i32>} : memref<8x128xf32, #tpu.memory_space<vmem>>, vector<8x128xf32>,
    return
  }
  func.func @transform_0(%arg0: i32, %arg1: memref<1xi32, #tpu.memory_space<smem>>) -> (i32, i32) {
    %c0_i32 = arith.constant 0 : i32
    %c0_i32_0 = arith.constant 0 : i32
    return %arg0, %c0_i32 : i32, i32
  }
  func.func @transform_1(%arg0: i32, %arg1: memref<1xi32, #tpu.memory_space<smem>>) -> (i32, i32, i32) {
    %c0 = arith.constant 0 : index
    %0 = memref.load %arg1[%c0] : memref<1xi32, #tpu.memory_space<smem>>
    %c0_i32 = arith.constant 0 : i32
    %c0_i32_0 = arith.constant 0 : i32
    %c0_i32_1 = arith.constant 0 : i32
    return %0, %c0_i32, %c0_i32_0 : i32, i32, i32
  }
  func.func @transform_2(%arg0: i32, %arg1: memref<1xi32, #tpu.memory_space<smem>>) -> (i32, i32) {
    %c0_i32 = arith.constant 0 : i32
    %c0_i32_0 = arith.constant 0 : i32
    return %arg0, %c0_i32 : i32, i32
  }
}

</mosaic_0001>

<bundles_post_ra>
// kernel: tpu_custom_call.1
= control target key start
LH: loop header
LB: loop body
LE: loop exit
PB: predicated region body
PF: predicated region fallthrough
CT: control target
= control target key end

     0   :  { %9 = vsyncpa [#allocation5], 0  ;;  %s236_s0 = inlined_call_operand.<no memory space> [shape: s32[1], index: 0, kind: input, shape index: {}]   ;;  %s237_s1 = inlined_call_operand.hbm [shape: f32[8,128], index: 1, kind: input, shape index: {}]   ;;  %s238_s2 = inlined_call_operand.hbm [shape: f32[3,128,128], index: 2, kind: input, shape index: {}]   ;;  %s239_s3 = inlined_call_operand.hbm [shape: f32[8,128], index: 3, kind: output, shape index: {}]  }
   0x1   :  { %10 = vsyncpa [#allocation8], 0 }
   0x2   :  { %11 = vsyncpa [#allocation6], 0  ;;  %s17_s14 = sshll.u32 %s237_s1, 4  ;;  %s193_s15 = smov [#allocation4]   ;;  %s18_s14 = int_to_ptr.hbm [resolvable:$true] %s17_s14 }
   0x3   :  { %s19_s16 = sshll.u32 %s193_s15, 4  ;;  %s109_s19 = sshll.u32 %s236_s0, 7  ;;  %s20_s16 = int_to_ptr.vmem [resolvable:$true] %s19_s16 }
   0x4   :  { %22 = dma.hbm_to_vmem [thread:$0]  %s18_s14, 128, %s20_s16, [#allocation5]  }
   0x5   :  { %s30_s22 = scalar_lea.hbm %s238_s2, %s109_s19  ;;  %s194_s24 = smov [#allocation7]  }
   0x6   :  { %s31_s23 = sshll.u32 %s30_s22, 4  ;;  %s33_s25 = sshll.u32 %s194_s24, 4  ;;  %s32_s23 = int_to_ptr.hbm [resolvable:$true] %s31_s23  ;;  %s34_s25 = int_to_ptr.vmem [resolvable:$true] %s33_s25 }
   0x7   :  { %s139_s26 = sshra.s32 %s32_s23, 4  ;;  %s143_s29 = scalar_lea.hbm %s238_s2, 384  ;;  %s140_s26 = int_to_ptr.hbm [resolvable:$true] %s139_s26 }
   0x8   :  { %s141_s1 = scalar_lea.hbm %s140_s26, 128  ;;  %p144_p1 = scmp.lt.s32.totalorder %s140_s26, %s238_s2 }
   0x9   :  { %p142_p0 = scmp.ne.s32.totalorder %s140_s26, %s141_s1  ;;  %p145_p2 = scmp.lt.s32.totalorder %s143_s29, %s141_s1 }
   0xb   :  { %p146_p3 = por %p145_p2, %p144_p1 }
   0xd   :  { %p147_p4 = pnand %p146_p3, %p142_p0 }
   0xf   :  { %150 = shalt.err (!%p147_p4)
}
  0x10   :  { %s195_s4 = smov 128   ;;  %s196_s5 = smov 8  }
  0x11   :  { %39 = dma.hbm_to_vmem [thread:$0]  %s32_s23, 2048, %s34_s25, [#allocation8], %s195_s4, %s195_s4, %s196_s5  }
  0x12   :  { %187 = dma.done.wait [#allocation5], 128  }
  0x13   :  { %188 = vsyncadd [#allocation5], 4294967168 }
  0x14   :  { %189 = dma.done.wait [#allocation8], 2048  }
  0x15   :  { %190 = vsyncadd [#allocation8], 4294965248  ;;  %v65_v0 = vld [vmem:[#allocation7 + $0x78] sm:$0xff]  ;;  %v64_v1 = vld [vmem:[#allocation7 + $0x70] sm:$0xff]  ;;  %s197_s2 = smov [#allocation9]   ;;  %s94_s9 = sshll.u32 %s239_s3, 4  ;;  %s95_s9 = int_to_ptr.hbm [resolvable:$true] %s94_s9 }
  0x16   :  { %66 = vmatpush.msra.mxu0 %v65_v0  ;;  %v63_v2 = vld [vmem:[#allocation7 + $0x68] sm:$0xff]  ;;  %v62_v3 = vld [vmem:[#allocation7 + $0x60] sm:$0xff]  ;;  %v61_v4 = vld [vmem:[#allocation7 + $0x58] sm:$0xff]  ;;  %s92_s6 = sshll.u32 %s197_s2, 4  ;;  %s93_s6 = int_to_ptr.vmem [resolvable:$true] %s92_s6 }
  0x17   :  { %v60_v5 = vld [vmem:[#allocation7 + $0x50] sm:$0xff]  ;;  %v59_v6 = vld [vmem:[#allocation7 + $0x48] sm:$0xff]  ;;  %v58_v7 = vld [vmem:[#allocation7 + $0x40] sm:$0xff] }
  0x18   :  { %67 = vmatpush.msra.mxu0 %v64_v1  ;;  %v57_v8 = vld [vmem:[#allocation7 + $0x38] sm:$0xff]  ;;  %v56_v9 = vld [vmem:[#allocation7 + $0x30] sm:$0xff]  ;;  %v55_v10 = vld [vmem:[#allocation7 + $0x28] sm:$0xff] }
  0x19   :  { %v54_v11 = vld [vmem:[#allocation7 + $0x20] sm:$0xff]  ;;  %v53_v12 = vld [vmem:[#allocation7 + $0x18] sm:$0xff]  ;;  %v52_v13 = vld [vmem:[#allocation7 + $0x10] sm:$0xff] }
  0x1a   :  { %68 = vmatpush.msra.mxu0 %v63_v2  ;;  %v51_v14 = vld [vmem:[#allocation7 + $0x8] sm:$0xff]  ;;  %v50_v15 = vld [vmem:[#allocation7] sm:$0xff]  ;;  %v49_v16 = vld [vmem:[#allocation4] sm:$0xff] }
  0x1c   :  { %69 = vmatpush.msra.mxu0 %v62_v3 }
  0x1e   :  { %70 = vmatpush.msra.mxu0 %v61_v4 }
  0x20   :  { %71 = vmatpush.msra.mxu0 %v60_v5 }
  0x22   :  { %72 = vmatpush.msra.mxu0 %v59_v6 }
  0x24   :  { %73 = vmatpush.msra.mxu0 %v58_v7 }
  0x26   :  { %74 = vmatpush.msra.mxu0 %v57_v8 }
  0x28   :  { %75 = vmatpush.msra.mxu0 %v56_v9 }
  0x2a   :  { %76 = vmatpush.msra.mxu0 %v55_v10 }
  0x2c   :  { %77 = vmatpush.msra.mxu0 %v54_v11 }
  0x2e   :  { %78 = vmatpush.msra.mxu0 %v53_v12 }
  0x30   :  { %79 = vmatpush.msra.mxu0 %v52_v13 }
  0x32   :  { %80 = vmatpush.msra.mxu0 %v51_v14 }
  0x34   :  { %81 = vmatpush.msra.mxu0 %v50_v15 }
  0x35   :  { %82 = vmatmul.f32.vlgmr.msra.gmra.mxu0 %v49_v16 }
  0xb2   :  { %v83_v17 = vpop.f32.mrf.mxu0 }
  0xb3   :  { %86 = vst [vmem:[#allocation9] sm:$0xff] %v83_v17 }
  0xb4   :  { %97 = dma.vmem_to_hbm [thread:$0]  %s93_s6, 128, %s95_s9, [#allocation6]  }
  0xb5   :  { %191 = dma.done.wait [#allocation6], 128  }
  0xb6   :  { %192 = vsyncadd [#allocation6], 4294967168 }
  0xb7   :  { %102 = vsyncpa [#allocation5], 1 }
  0xb8   :  { %103 = vsyncpa [#allocation8], 1 }
  0xb9   :  { %104 = vsyncpa [#allocation6], 1 }

</bundles_post_ra>
